<compile_context>
chip_gen: v7x
topology: tpu7x:2x2x1
jax: 0.10.0
libtpu: 0.0.40
codegen_flags: <defaults>
</compile_context>

<pallas_src>
import jax
import jax.numpy as jnp
from jax.experimental import pallas as pl
from jax.experimental.pallas import tpu as pltpu

# Synthetic configuration (args.act == 'mixed', SUPRA_NUMBERS[1] == 13)
NSUPRA = 13
NDENDS = 32
NSUB = NDENDS - NSUPRA
HID = 5                      # each dendritic branch layer has 5 units
BATCH = 256                  # rows per call (>=128 so the MXU/sublanes are fed)
TB = 128                     # batch tile per grid step


def net_mixed_kernel(x_ref, wf_ref, ws_ref, bs_ref, out_ref):
    x = x_ref[...]                                   # (TB, NDENDS) f32
    wf = wf_ref[...]                                 # (NDENDS, 2*HID) block-diag, pre-transposed

    # Single fused matmul: cols 0:HID == layer1(x_supra), cols HID:2*HID == layer2(x_sub)
    h = jnp.dot(x, wf, preferred_element_type=jnp.float32)      # (TB, 2*HID)

    # Apply mysupra to the first HID columns, mysub to the rest (column mask, no lane slices)
    col = jax.lax.broadcasted_iota(jnp.int32, h.shape, dimension=1)
    supra = 5.0 * jax.nn.sigmoid(h / 5.0 - 5.0)
    sub = jnp.power(jnp.maximum(h, 0.0) + 2.0, 0.7) - 2.0
    act = jnp.where(col < HID, supra, sub)                      # (TB, 2*HID)

    # Soma layer: N=1 matmul replaced by VPU multiply + lane reduction.
    # ws_ref is the (1, 2*HID) soma weight row (broadcast over TB rows).
    soma = jnp.sum(act * ws_ref[...], axis=1, keepdims=True) + bs_ref[...]   # (TB, 1)
    out_ref[...] = soma


def net_forward(x, w1, w2, w_soma, b_soma):
    """x: (B, NDENDS); w1: (HID, NSUPRA); w2: (HID, NSUB); w_soma: (1, 2*HID); b_soma: (1,).

    Weight fusion / transposition is done here (free: XLA folds it into the
    parameter layout) so the kernel body contains no transposes or slices.
    """
    x = x.astype(jnp.float32)
    B = x.shape[0]

    # Block-diagonal fused weight in (in_features, out_features) orientation.
    w_fused = jnp.zeros((NDENDS, 2 * HID), jnp.float32)
    w_fused = w_fused.at[0:NSUPRA, 0:HID].set(w1.astype(jnp.float32).T)
    w_fused = w_fused.at[NSUPRA:NDENDS, HID:2 * HID].set(w2.astype(jnp.float32).T)

    ws_row = w_soma.reshape(1, 2 * HID).astype(jnp.float32)
    bias = b_soma.reshape(1, 1).astype(jnp.float32)

    # Pad the batch up to a multiple of TB (grid steps of TB rows each).
    n_blocks = pl.cdiv(B, TB)
    b_pad = n_blocks * TB
    if b_pad != B:
        x = jnp.pad(x, ((0, b_pad - B), (0, 0)))

    out = pl.pallas_call(
        net_mixed_kernel,
        out_shape=jax.ShapeDtypeStruct((b_pad, 1), jnp.float32),
        grid=(n_blocks,),
        in_specs=[
            pl.BlockSpec((TB, NDENDS), lambda i: (i, 0)),          # activations: tiled over batch
            pl.BlockSpec((NDENDS, 2 * HID), lambda i: (0, 0)),     # fused weight: resident
            pl.BlockSpec((1, 2 * HID), lambda i: (0, 0)),          # soma weight row
            pl.BlockSpec((1, 1), lambda i: (0, 0)),                # soma bias
        ],
        out_specs=pl.BlockSpec((TB, 1), lambda i: (i, 0)),
        compiler_params=pltpu.CompilerParams(
            dimension_semantics=("parallel",)),
    )(x, w_fused, ws_row, bias)

    # TODO(synk): output last-dim is 1 (masked vst); if many cells are batched,
    # accumulate their scalar outputs into one lane-dense (B, n_cells) slab instead.
    return out[:B]


def net_forward_ref(x, w1, w2, w_soma, b_soma):
    """Pure-JAX reference mirroring the PyTorch forward exactly."""
    x_supra = x[:, :NSUPRA]
    x_sub = x[:, NSUPRA:]
    a = 5.0 * jax.nn.sigmoid(x_supra @ w1.T / 5.0 - 5.0)
    b = jnp.power(jnp.maximum(x_sub @ w2.T, 0.0) + 2.0, 0.7) - 2.0
    c = jnp.concatenate([a, b], axis=1)
    return c @ w_soma.T + b_soma[None, :]


if __name__ == "__main__":
    key = jax.random.PRNGKey(0)
    kx, k1, k2, ks, kb = jax.random.split(key, 5)

    # Deterministic parameter init (PyTorch-like uniform(-1/sqrt(fan_in), +1/sqrt(fan_in)))
    x = jax.random.normal(kx, (BATCH, NDENDS), dtype=jnp.float32)
    w1 = jax.random.uniform(k1, (HID, NSUPRA), jnp.float32,
                            -1.0 / jnp.sqrt(NSUPRA), 1.0 / jnp.sqrt(NSUPRA))
    w2 = jax.random.uniform(k2, (HID, NSUB), jnp.float32,
                            -1.0 / jnp.sqrt(NSUB), 1.0 / jnp.sqrt(NSUB))
    w_soma = jax.random.uniform(ks, (1, 2 * HID), jnp.float32,
                                -1.0 / jnp.sqrt(2 * HID), 1.0 / jnp.sqrt(2 * HID))
    b_soma = jax.random.uniform(kb, (1,), jnp.float32,
                                -1.0 / jnp.sqrt(2 * HID), 1.0 / jnp.sqrt(2 * HID))

    out = net_forward(x, w1, w2, w_soma, b_soma)
    out = jax.block_until_ready(out)

    ref = net_forward_ref(x, w1, w2, w_soma, b_soma)
    assert out.shape == (BATCH, 1), out.shape
    assert jnp.allclose(out, ref, atol=1e-5, rtol=1e-5), (out, ref)

    # TODO(synk): 'linear' / 'sub' / 'supra' single-branch act paths not emitted
    # (argparse-selected at runtime in the original); only the 'mixed' path is kernelized.
    print("KERNEL_OK")
</pallas_src>

<mosaic_0001>
module attributes {stable_mosaic.version = 11 : i64} {
  func.func @net_mixed_kernel(%arg0: i32, %arg1: memref<128x32xf32, #tpu.memory_space<vmem>>, %arg2: memref<32x10xf32, #tpu.memory_space<vmem>>, %arg3: memref<1x10xf32, #tpu.memory_space<vmem>>, %arg4: memref<1x1xf32, #tpu.memory_space<vmem>>, %arg5: memref<128x1xf32, #tpu.memory_space<vmem>>) attributes {dimension_semantics = [#tpu.dimension_semantics<parallel>], iteration_bounds = array<i64: 2>, scalar_prefetch = 0 : i64, scratch_operands = 0 : i64, tpu.core_type = #tpu.core_type<tc>, window_params = [{transform_indices = @transform_0, window_bounds = array<i64: 128, 32>}, {pipeline_mode = #tpu.pipeline_mode<synchronous>, transform_indices = @transform_1, window_bounds = array<i64: 32, 10>}, {pipeline_mode = #tpu.pipeline_mode<synchronous>, transform_indices = @transform_2, window_bounds = array<i64: 1, 10>}, {pipeline_mode = #tpu.pipeline_mode<synchronous>, transform_indices = @transform_3, window_bounds = array<i64: 1, 1>}, {transform_indices = @transform_4, window_bounds = array<i64: 128, 1>}]} {
    %c0 = arith.constant 0 : index
    %c0_0 = arith.constant 0 : index
    %0 = vector.load %arg1[%c0, %c0_0] : memref<128x32xf32, #tpu.memory_space<vmem>>, vector<128x32xf32>
    %c0_1 = arith.constant 0 : index
    %c0_2 = arith.constant 0 : index
    %1 = vector.load %arg2[%c0_1, %c0_2] : memref<32x10xf32, #tpu.memory_space<vmem>>, vector<32x10xf32>
    %cst = arith.constant dense<0.000000e+00> : vector<128x10xf32>
    %2 = tpu.matmul %0, %1, %cst {dimension_numbers = #tpu.dot_dimension_numbers<[1], [0], [0], [1], [0, 0, 1, 1], [], []>} : vector<128x32xf32>, vector<32x10xf32>, vector<128x10xf32> -> vector<128x10xf32>
    %3 = tpu.iota {dimensions = array<i32: 1>} : vector<128x10xi32>
    %cst_3 = arith.constant 5.000000e+00 : f32
    %4 = vector.broadcast %cst_3 : f32 to vector<128x10xf32>
    %5 = arith.divf %2, %4 : vector<128x10xf32>
    %cst_4 = arith.constant 5.000000e+00 : f32
    %6 = vector.broadcast %cst_4 : f32 to vector<128x10xf32>
    %7 = arith.subf %5, %6 : vector<128x10xf32>
    %8 = arith.negf %7 : vector<128x10xf32>
    %9 = math.exp %8 : vector<128x10xf32>
    %cst_5 = arith.constant 1.000000e+00 : f32
    %10 = vector.broadcast %cst_5 : f32 to vector<128x10xf32>
    %11 = arith.addf %10, %9 : vector<128x10xf32>
    %12 = arith.divf %10, %11 : vector<128x10xf32>
    %cst_6 = arith.constant 5.000000e+00 : f32
    %13 = vector.broadcast %cst_6 : f32 to vector<128x10xf32>
    %14 = arith.mulf %13, %12 : vector<128x10xf32>
    %cst_7 = arith.constant 0.000000e+00 : f32
    %15 = vector.broadcast %cst_7 : f32 to vector<128x10xf32>
    %16 = arith.maximumf %2, %15 : vector<128x10xf32>
    %cst_8 = arith.constant 2.000000e+00 : f32
    %17 = vector.broadcast %cst_8 : f32 to vector<128x10xf32>
    %18 = arith.addf %16, %17 : vector<128x10xf32>
    %cst_9 = arith.constant 0.699999988 : f32
    %19 = vector.broadcast %cst_9 : f32 to vector<128x10xf32>
    %20 = math.powf %18, %19 : vector<128x10xf32>
    %cst_10 = arith.constant 2.000000e+00 : f32
    %21 = vector.broadcast %cst_10 : f32 to vector<128x10xf32>
    %22 = arith.subf %20, %21 : vector<128x10xf32>
    %c5_i32 = arith.constant 5 : i32
    %23 = vector.broadcast %c5_i32 : i32 to vector<128x10xi32>
    %24 = arith.cmpi slt, %3, %23 : vector<128x10xi32>
    %25 = arith.select %24, %14, %22 : vector<128x10xi1>, vector<128x10xf32>
    %c0_11 = arith.constant 0 : index
    %c0_12 = arith.constant 0 : index
    %26 = vector.load %arg3[%c0_11, %c0_12] : memref<1x10xf32, #tpu.memory_space<vmem>>, vector<1x10xf32>
    %27 = vector.broadcast %26 : vector<1x10xf32> to vector<128x10xf32>
    %28 = arith.mulf %25, %27 : vector<128x10xf32>
    %cst_13 = arith.constant dense<0.000000e+00> : vector<128xf32>
    %29 = vector.multi_reduction <add>, %28, %cst_13 [1] : vector<128x10xf32> to vector<128xf32>
    %30 = vector.shape_cast %29 : vector<128xf32> to vector<128x1xf32>
    %c0_14 = arith.constant 0 : index
    %c0_15 = arith.constant 0 : index
    %31 = vector.load %arg4[%c0_14, %c0_15] : memref<1x1xf32, #tpu.memory_space<vmem>>, vector<1x1xf32>
    %32 = vector.broadcast %31 : vector<1x1xf32> to vector<128x1xf32>
    %33 = arith.addf %30, %32 : vector<128x1xf32>
    %c0_16 = arith.constant 0 : index
    %c0_17 = arith.constant 0 : index
    %34 = vector.load %arg5[%c0_16, %c0_17] : memref<128x1xf32, #tpu.memory_space<vmem>>, vector<128x1xf32>
    tpu.vector_store %arg5[%c0_16, %c0_17], %33 {strides = array<i32>} : memref<128x1xf32, #tpu.memory_space<vmem>>, vector<128x1xf32>,
    return
  }
  func.func @transform_0(%arg0: i32) -> (i32, i32) {
    %c0_i32 = arith.constant 0 : i32
    %c0_i32_0 = arith.constant 0 : i32
    return %arg0, %c0_i32 : i32, i32
  }
  func.func @transform_1(%arg0: i32) -> (i32, i32) {
    %c0_i32 = arith.constant 0 : i32
    %c0_i32_0 = arith.constant 0 : i32
    %c0_i32_1 = arith.constant 0 : i32
    return %c0_i32, %c0_i32_0 : i32, i32
  }
  func.func @transform_2(%arg0: i32) -> (i32, i32) {
    %c0_i32 = arith.constant 0 : i32
    %c0_i32_0 = arith.constant 0 : i32
    %c0_i32_1 = arith.constant 0 : i32
    return %c0_i32, %c0_i32_0 : i32, i32
  }
  func.func @transform_3(%arg0: i32) -> (i32, i32) {
    %c0_i32 = arith.constant 0 : i32
    %c0_i32_0 = arith.constant 0 : i32
    %c0_i32_1 = arith.constant 0 : i32
    return %c0_i32, %c0_i32_0 : i32, i32
  }
  func.func @transform_4(%arg0: i32) -> (i32, i32) {
    %c0_i32 = arith.constant 0 : i32
    %c0_i32_0 = arith.constant 0 : i32
    return %arg0, %c0_i32 : i32, i32
  }
}

</mosaic_0001>

<bundles_post_ra>
// kernel: tpu_custom_call.1
= control target key start
LH: loop header
LB: loop body
LE: loop exit
PB: predicated region body
PF: predicated region fallthrough
CT: control target
= control target key end

     0   :  { %s1542_s17 = smov 0   ;;  %s2261_s0 = inlined_call_operand.vmem [shape: f32[256,32], index: 0, kind: input, shape index: {}]   ;;  %s2262_s1 = inlined_call_operand.vmem [shape: f32[32,10], index: 1, kind: input, shape index: {}]   ;;  %s2263_s2 = inlined_call_operand.vmem [shape: f32[1,10], index: 2, kind: input, shape index: {}]   ;;  %s2264_s3 = inlined_call_operand.<no memory space> [shape: f32[1,1], index: 3, kind: input, shape index: {}]   ;;  %s2265_s4 = inlined_call_operand.vmem [shape: f32[256,1], index: 4, kind: output, shape index: {}]  }
   0x1   :  { %v9_v0 = vstv %s2264_s3 }
   0x2   :  { %10 = vst [vmem:[#allocation2] sm:$0x1] %v9_v0 }
   0x3 LB: > { %s813_s18 = sadd.s32 4294967295, %s1512_s17   ;;  %p817_p0 = scmp.ge.s32.totalorder %s1512_s17, 1  ;;  %s1512_s17 = sphi %s1542_s17, %s16_s17  }
   0x4   : > { %p165_p1 = scmp.lt.s32.totalorder %s1512_s17, 3 }
   0x6   : > { %p166_p2 = pnand %p817_p0, %p165_p1 }
   0x7   : > { %v219_v1 = vld [vmem:[%s2262_s1] sm:$0xff] (!%p166_p2)  ;;  %v220_v2 = vld [vmem:[%s2262_s1 + $0x8] sm:$0xff] (!%p166_p2)  ;;  %v221_v3 = vld [vmem:[%s2262_s1 + $0x10] sm:$0xff] (!%p166_p2)  ;;  %s818_s24 = sshll.u32 (!%p166_p2), %s813_s18, 4  ;;  %vm223_vm0 = vcmask (!%p166_p2), 261120  }
   0x8   : > { %169 = sbr.rel (%p166_p2) target bundleno = 507 (0x1fb), region = 36  ;;  %v942_v4 = vpack.c.bf16 (!%p166_p2), %v220_v2, %v219_v1  ;;  %v222_v5 = vld [vmem:[%s2262_s1 + $0x18] sm:$0xff] (!%p166_p2)  ;;  %p192_p3 = scmp.lt.s32.totalorder (!%p166_p2), %s818_s24, 31 }
   0x9   : > { %v946_v6 = vpack.c.bf16 (!%p166_p2), %v222_v5, %v221_v3 }
   0xa   : > { %943 = vmatprep.subr.bf16.mxu0 (!%p166_p2), %v942_v4  ;;  %950 = vmatprep.subr.bf16.mxu1 (!%p166_p2), %v942_v4 }
   0xb   : > { %945 = vmatpush3.bf16.msra.mxu0 (!%p166_p2), %v942_v4  ;;  %952 = vmatpush3.bf16.msra.mxu1 (!%p166_p2), %v942_v4 }
   0xc   : > { %947 = vmatprep.subr.bf16.mxu0 (!%p166_p2), %v946_v6  ;;  %951 = vmatprep.subr.bf16.mxu1 (!%p166_p2), %v946_v6 }
   0xf   : > { %s2338_s24 = smov (!%p192_p3, %s818_s24), 31  ;;  %949 = vmatpush3.bf16.msra.mxu0 %v946_v6  ;;  %953 = vmatpush3.bf16.msra.mxu1 %v946_v6 }
  0x10   : > { %s819_s27 = sshll.u32 %s2338_s24, 3 }
  0x11   : > { %s1570_s30 = scalar_lea.vmem %s2261_s0, %s819_s27  ;;  %s2224_s9 = scalar_lea.vmem %s2265_s4, %s819_s27 }
  0x12   : > { %v203_v7 = vld [vmem:[%s1570_s30] sm:$0xff]  ;;  %v204_v9 = vld [vmem:[%s1570_s30 + $0x8] sm:$0xff]  ;;  %v205_v11 = vld [vmem:[%s1570_s30 + $0x10] sm:$0xff] }
  0x13   : > { %v211_v8 = vld [vmem:[%s1570_s30 + $0x40] sm:$0xff]  ;;  %v212_v10 = vld [vmem:[%s1570_s30 + $0x48] sm:$0xff]  ;;  %918 = vmatprep.mubr.msk.f32.mxu0 %vm223_vm0, %v203_v7  ;;  %v213_v12 = vld [vmem:[%s1570_s30 + $0x50] sm:$0xff] }
  0x14   : > { %930 = vmatprep.mubr.msk.f32.mxu1 %vm223_vm0, %v211_v8  ;;  %919 = vmatmul.mubr.msk.f32.vlgmr.msra.gmra.mrb[0].mxu0 %vm223_vm0, %v204_v9  ;;  %v206_v13 = vld [vmem:[%s1570_s30 + $0x18] sm:$0xff]  ;;  %v207_v15 = vld [vmem:[%s1570_s30 + $0x20] sm:$0xff]  ;;  %v208_v17 = vld [vmem:[%s1570_s30 + $0x28] sm:$0xff] }
  0x15   : > { %931 = vmatmul.mubr.msk.f32.vlgmr.msra.gmra.mrb[0].mxu1 %vm223_vm0, %v212_v10  ;;  %921 = vmatprep.mubr.msk.f32.mxu0 %vm223_vm0, %v205_v11  ;;  %v214_v14 = vld [vmem:[%s1570_s30 + $0x58] sm:$0xff]  ;;  %v215_v16 = vld [vmem:[%s1570_s30 + $0x60] sm:$0xff]  ;;  %v216_v18 = vld [vmem:[%s1570_s30 + $0x68] sm:$0xff] }
  0x16   : > { %933 = vmatprep.mubr.msk.f32.mxu1 %vm223_vm0, %v213_v12  ;;  %v209_v19 = vld [vmem:[%s1570_s30 + $0x30] sm:$0xff]  ;;  %v210_v21 = vld [vmem:[%s1570_s30 + $0x38] sm:$0xff] }
  0x17   : > { %v217_v20 = vld [vmem:[%s1570_s30 + $0x70] sm:$0xff]  ;;  %v218_v22 = vld [vmem:[%s1570_s30 + $0x78] sm:$0xff] }
  0x18   : > { %922 = vmatmul.mubr.msk.f32.gmra.mrb[2].mxu0 %vm223_vm0, %v206_v13 }
  0x19   : > { %934 = vmatmul.mubr.msk.f32.gmra.mrb[2].mxu1 %vm223_vm0, %v214_v14  ;;  %924 = vmatprep.mubr.msk.f32.mxu0 %vm223_vm0, %v207_v15 }
  0x1a   : > { %936 = vmatprep.mubr.msk.f32.mxu1 %vm223_vm0, %v215_v16 }
  0x1c   : > { %925 = vmatmul.mubr.msk.f32.gmra.mrb[4].mxu0 %vm223_vm0, %v208_v17 }
  0x1d   : > { %937 = vmatmul.mubr.msk.f32.gmra.mrb[4].mxu1 %vm223_vm0, %v216_v18  ;;  %927 = vmatprep.mubr.msk.f32.mxu0 %vm223_vm0, %v209_v19 }
  0x1e   : > { %939 = vmatprep.mubr.msk.f32.mxu1 %vm223_vm0, %v217_v20 }
  0x20   : > { %928 = vmatmul.mubr.msk.f32.gmra.mrb[6].mxu0 %vm223_vm0, %v210_v21 }
  0x21   : > { %940 = vmatmul.mubr.msk.f32.gmra.mrb[6].mxu1 %vm223_vm0, %v218_v22 }
  0xe7   : > { %v1604_v23 = vpop.f32.mrb[0].mxu0 }
  0xe8   : > { %v1606_v24 = vpop.f32.mrb[0].mxu1  ;;  %v421_v25 = vmul.f32 0.2, %v1604_v23  ;;  %v1610_v27 = vpop.f32.mrb[1].mxu0 }
  0xe9   : > { %v429_v26 = vmul.f32 0.2, %v1606_v24  ;;  %v1612_v28 = vpop.f32.mrb[1].mxu1  ;;  %v420_v31 = vmul.f32 0.2, %v1610_v27 }
  0xea   : > { %v839_v29 = vadd.f32 -5.0, %v421_v25  ;;  %v428_v32 = vmul.f32 0.2, %v1612_v28 }
  0xeb   : > { %v847_v30 = vadd.f32 -5.0, %v429_v26  ;;  %v1616_v35 = vpop.f32.mrb[2].mxu0  ;;  %v838_v37 = vadd.f32 -5.0, %v420_v31 }
  0xec   : > { %v855_v33 = vmul.f32 -1.442695, %v839_v29  ;;  %v1618_v36 = vpop.f32.mrb[2].mxu1  ;;  %v846_v38 = vadd.f32 -5.0, %v428_v32  ;;  %v1620_v39 = vpop.f32.mrb[3].mxu0  ;;  %v573_v29 = vmax.f32 %v1606_v24, 0.0 }
  0xed   : > { %v863_v34 = vmul.f32 -1.442695, %v847_v30  ;;  %v1622_v40 = vpop.f32.mrb[3].mxu1  ;;  %v423_v41 = vmul.f32 0.2, %v1616_v35  ;;  %v567_v24 = vmax.f32 %v1616_v35, 0.0 }
  0xee   : > { %1378 = vpow2.f32 %v855_v33  ;;  %v431_v42 = vmul.f32 0.2, %v1618_v36  ;;  %v854_v43 = vmul.f32 -1.442695, %v838_v37  ;;  %v862_v44 = vmul.f32 -1.442695, %v846_v38 }
  0xef   : > { %1380 = vpow2.f32 %v863_v34  ;;  %v1626_v45 = vpop.f32.mrb[4].mxu0  ;;  %v841_v46 = vadd.f32 -5.0, %v423_v41  ;;  %v422_v48 = vmul.f32 0.2, %v1620_v39  ;;  %v430_v50 = vmul.f32 0.2, %v1622_v40 }
  0xf0   : > { %v849_v47 = vadd.f32 -5.0, %v431_v42  ;;  %v1629_v49 = vpop.f32.mrb[4].mxu1  ;;  %1382 = vpow2.f32 %v854_v43  ;;  %v1632_v51 = vpop.f32.mrb[5].mxu0  ;;  %v425_v57 = vmul.f32 0.2, %v1626_v45  ;;  %v565_v37 = vmax.f32 %v1604_v23, 0.0 }
  0xf1   : > { %v1634_v52 = vpop.f32.mrb[5].mxu1  ;;  %1384 = vpow2.f32 %v862_v44  ;;  %v857_v53 = vmul.f32 -1.442695, %v841_v46  ;;  %v840_v55 = vadd.f32 -5.0, %v422_v48  ;;  %v848_v56 = vadd.f32 -5.0, %v430_v50 }
  0xf2   : > { %v865_v54 = vmul.f32 -1.442695, %v849_v47  ;;  %v433_v60 = vmul.f32 0.2, %v1629_v49  ;;  %v843_v63 = vadd.f32 -5.0, %v425_v57  ;;  %v564_v42 = vmax.f32 %v1610_v27, 0.0 }
  0xf3   : > { %v1637_v58 = vpop.f32.mrb[6].mxu0  ;;  %1386 = vpow2.f32 %v857_v53  ;;  %v856_v59 = vmul.f32 -1.442695, %v840_v55  ;;  %v864_v62 = vmul.f32 -1.442695, %v848_v56  ;;  %v1654_v46 = vadd.f32 2.0, %v573_v29 }
  0xf4   : > { %v1640_v61 = vpop.f32.mrb[6].mxu1  ;;  %1388 = vpow2.f32 %v865_v54  ;;  %v1642_v0 = vpop.f32.mrb[7].mxu0  ;;  %v851_v2 = vadd.f32 -5.0, %v433_v60  ;;  %v859_v3 = vmul.f32 -1.442695, %v843_v63  ;;  %v1657_v53 = vadd.f32 2.0, %v565_v37 }
  0xf5   : > { %v1644_v1 = vpop.f32.mrb[7].mxu1  ;;  %1390 = vpow2.f32 %v856_v59  ;;  %v424_v4 = vmul.f32 0.2, %v1632_v51  ;;  %v432_v7 = vmul.f32 0.2, %v1634_v52  ;;  %v572_v23 = vmax.f32 %v1612_v28, 0.0 }
  0xf6   : > { %1392 = vpow2.f32 %v864_v62  ;;  %v867_v6 = vmul.f32 -1.442695, %v851_v2  ;;  %v427_v14 = vmul.f32 0.2, %v1637_v58  ;;  %v435_v17 = vmul.f32 0.2, %v1640_v61 }
  0xf7   : > { %1394 = vpow2.f32 %v859_v3  ;;  %v842_v9 = vadd.f32 -5.0, %v424_v4  ;;  %v850_v13 = vadd.f32 -5.0, %v432_v7  ;;  %v426_v33 = vmul.f32 0.2, %v1642_v0 }
  0xf8   : > { %v1379_v5 = vpop.eup %1378  ;;  %1396 = vpow2.f32 %v867_v6  ;;  %v845_v19 = vadd.f32 -5.0, %v427_v14  ;;  %v853_v31 = vadd.f32 -5.0, %v435_v17  ;;  %v1660_v55 = vadd.f32 2.0, %v564_v42 }
  0xf9   : > { %v1381_v8 = vpop.eup %1380  ;;  %v501_v10 = vadd.f32 1.0, %v1379_v5  ;;  %v858_v16 = vmul.f32 -1.442695, %v842_v9  ;;  %v866_v25 = vmul.f32 -1.442695, %v850_v13  ;;  %v844_v50 = vadd.f32 -5.0, %v426_v33 }
  0xfa   : > { %v1383_v11 = vpop.eup %1382  ;;  %v509_v12 = vadd.f32 1.0, %v1381_v8  ;;  %v861_v32 = vmul.f32 -1.442695, %v845_v19  ;;  %v869_v47 = vmul.f32 -1.442695, %v853_v31  ;;  %v1664_v57 = vadd.f32 2.0, %v567_v24 }
  0xfb   : > { %v1385_v15 = vpop.eup %1384  ;;  %v500_v18 = vadd.f32 1.0, %v1383_v11  ;;  %1398 = vrcp.f32 %v501_v10  ;;  %v434_v35 = vmul.f32 0.2, %v1644_v1  ;;  %v1192_v59 = vand.u32 2147483647, %v1654_v46 }
  0xfc   : > { %v508_v21 = vadd.f32 1.0, %v1385_v15  ;;  %1400 = vrcp.f32 %v509_v12  ;;  %v575_v62 = vmax.f32 %v1618_v36, 0.0  ;;  %v860_v28 = vmul.f32 -1.442695, %v844_v50 }
  0xfd   : > { %v1387_v20 = vpop.eup %1386  ;;  %1402 = vpow2.f32 %v858_v16  ;;  %v1671_v2 = vadd.f32 2.0, %v572_v23  ;;  %v984_v3 = vand.u32 2147483647, %v1657_v53  ;;  %v958_v5 = vand.u32 2147483647, %v1660_v55 }
  0xfe   : > { %v1389_v22 = vpop.eup %1388  ;;  %v503_v30 = vadd.f32 1.0, %v1387_v20  ;;  %1404 = vrcp.f32 %v500_v18  ;;  %v574_v7 = vmax.f32 %v1622_v40, 0.0  ;;  %v852_v8 = vadd.f32 -5.0, %v434_v35 }
  0xff   : > { %v1391_v26 = vpop.eup %1390  ;;  %1406 = vrcp.f32 %v508_v21  ;;  %v511_v38 = vadd.f32 1.0, %v1389_v22  ;;  %v1036_v36 = vand.u32 2147483647, %v1664_v57  ;;  %v1683_v10 = vadd.f32 2.0, %v575_v62 }
 0x100   : > { %v1393_v34 = vpop.eup %1392  ;;  %v502_v43 = vadd.f32 1.0, %v1391_v26  ;;  %1408 = vpow2.f32 %v866_v25  ;;  %v566_v12 = vmax.f32 %v1620_v39, 0.0  ;;  %v1166_v40 = vand.u32 2147483647, %v1671_v2 }
 0x101   : > { %v1395_v41 = vpop.eup %1394  ;;  %1410 = vrcp.f32 %v503_v30  ;;  %v510_v48 = vadd.f32 1.0, %v1393_v34  ;;  %v1695_v16 = vadd.f32 2.0, %v574_v7  ;;  %v868_v17 = vmul.f32 -1.442695, %v852_v8 }
 0x102   : > { %v1397_v44 = vpop.eup %1396  ;;  %1412 = vpow2.f32 %v861_v32  ;;  %v505_v54 = vadd.f32 1.0, %v1395_v41  ;;  %v1244_v19 = vand.u32 2147483647, %v1683_v10  ;;  %v1704_v21 = vadd.f32 2.0, %v566_v12 }
 0x103   : > { %1414 = vrcp.f32 %v511_v38  ;;  %v513_v27 = vadd.f32 1.0, %v1397_v44  ;;  %v569_v26 = vmax.f32 %v1626_v45, 0.0  ;;  %v577_v29 = vmax.f32 %v1629_v49, 0.0 }
 0x104   : > { %1416 = vrcp.f32 %v502_v43  ;;  %v417_v30 = vlaneseq  ;;  %v568_v32 = vmax.f32 %v1632_v51, 0.0  ;;  %v1218_v34 = vand.u32 2147483647, %v1695_v16 }
 0x105   : > { %v1662_v56 = vpop.eup %1398  ;;  %1418 = vpow2.f32 %v869_v47  ;;  %v576_v38 = vmax.f32 %v1634_v52, 0.0  ;;  %v571_v45 = vmax.f32 %v1637_v58, 0.0  ;;  %v579_v41 = vmax.f32 %v1640_v61, 0.0 }
 0x106   : > { %v1668_v60 = vpop.eup %1400  ;;  %1420 = vrcp.f32 %v510_v48  ;;  %v570_v42 = vmax.f32 %v1642_v0, 0.0  ;;  %v1010_v43 = vand.u32 2147483647, %v1704_v21  ;;  %v578_v44 = vmax.f32 %v1644_v1, 0.0 }
 0x107   : > { %v1403_v63 = vpop.eup %1402  ;;  %1422 = vrcp.f32 %v505_v54  ;;  %v1724_v24 = vand.u32 127, %v417_v30  ;;  %v1728_v48 = vadd.f32 2.0, %v569_v26  ;;  %v1730_v58 = vadd.f32 2.0, %v577_v29 }
 0x108   : > { %v1674_v4 = vpop.eup %1404  ;;  %1424 = vrcp.f32 %v513_v27  ;;  %v504_v13 = vadd.f32 1.0, %v1403_v63  ;;  %v1732_v50 = vadd.f32 2.0, %v568_v32  ;;  %v1734_v0 = vadd.f32 2.0, %v576_v38 }
 0x109   : > { %v1677_v6 = vpop.eup %1406  ;;  %1426 = vlog2.f32 %v1192_v59  ;;  %v1736_v23 = vadd.f32 2.0, %v571_v45  ;;  %v1738_v27 = vadd.f32 2.0, %v579_v41  ;;  %v1740_v35 = vadd.f32 2.0, %v570_v42 }
 0x10a   : > { %v1409_v9 = vpop.eup %1408  ;;  %1428 = vpow2.f32 %v860_v28  ;;  %v1744_v7 = vadd.f32 2.0, %v578_v44  ;;  %vm1196_vm1 = vcmp.lt.f32.partialorder %v1654_v46, 0  ;;  %vm1197_vm2 = vcmp.eq.f32.partialorder %v1654_v46, 0 }
 0x10b   : > { %v1685_v11 = vpop.eup %1410  ;;  %1430 = vlog2.f32 %v984_v3  ;;  %v512_v39 = vadd.f32 1.0, %v1409_v9  ;;  %v1751_v12 = vmul.f32 5.0, %v1662_v56  ;;  %vm1758_vm3 = vcmp.eq.f32.partialorder %v1192_v59, 2139095040 }
 0x10c   : > { %v1413_v14 = vpop.eup %1412  ;;  %1432 = vlog2.f32 %v958_v5  ;;  %vm988_vm4 = vcmp.lt.f32.partialorder %v1657_v53, 0  ;;  %vm1209_vm5 = vcmp.ne.f32.partialorder %v1654_v46, %v1654_v46  ;;  %vm989_vm6 = vcmp.eq.f32.partialorder %v1657_v53, 0 }
 0x10d   : > { %v1693_v15 = vpop.eup %1414  ;;  %1434 = vlog2.f32 %v1036_v36  ;;  %v507_v22 = vadd.f32 1.0, %v1413_v14  ;;  %vm1198_vm7 = vcmp.eq.f32.partialorder %v1654_v46, 1065353216  ;;  %vm1773_vm8 = vcmp.eq.f32.partialorder %v984_v3, 2139095040  ;;  %v1890_v46 = vld [vmem:[%s2263_s2] ss:$0 sm:$0xff] }
 0x10e   : > { %v1699_v18 = vpop.eup %1416  ;;  %1436 = vlog2.f32 %v1166_v40  ;;  %v1778_v29 = vmul.f32 5.0, %v1674_v4  ;;  %vm962_vm9 = vcmp.lt.f32.partialorder %v1660_v55, 0  ;;  %v1296_v30 = vand.u32 2147483647, %v1730_v58 }
 0x10f   : > { %v1419_v20 = vpop.eup %1418  ;;  %1438 = vrcp.f32 %v504_v13  ;;  %vm1790_vm13 = vcmp.eq.f32.partialorder %v958_v5, 2139095040  ;;  %v1795_v4 = vmul.f32 5.0, %v1685_v11  ;;  %vm1804_vm11 = vcmp.eq.f32.partialorder %v1036_v36, 2139095040 }
 0x110   : > { %v1706_v25 = vpop.eup %1420  ;;  %1440 = vlog2.f32 %v1244_v19  ;;  %v515_v33 = vadd.f32 1.0, %v1419_v20  ;;  %v1088_v20 = vand.u32 2147483647, %v1728_v48  ;;  %v1816_v38 = vmul.f32 5.0, %v1677_v6 }
 0x111   : > { %v1712_v31 = vpop.eup %1422  ;;  %1442 = vpow2.f32 %v868_v17  ;;  %v1754_v17 = vmul.f32 5.0, %v1668_v60  ;;  %v1062_v60 = vand.u32 2147483647, %v1732_v50  ;;  %v1270_v36 = vand.u32 2147483647, %v1734_v0 }
 0x112   : > { %v1716_v37 = vpop.eup %1424  ;;  %1444 = vrcp.f32 %v512_v39  ;;  %vm1042_vm0 = vcmp.eq.f32.partialorder %v1664_v57, 1065353216  ;;  %vm1170_vm12 = vcmp.lt.f32.partialorder %v1671_v2, 0  ;;  %vm1171_vm14 = vcmp.eq.f32.partialorder %v1671_v2, 0 }
 0x113   : > { %v1427_v49 = vpop.eup %1426  ;;  %1446 = vrcp.f32 %v507_v22  ;;  %v1825_v41 = vmul.f32 5.0, %v1693_v15  ;;  %vm1833_vm15 = vcmp.eq.f32.partialorder %v1166_v40, 2139095040  ;;  %vm1248_vm10 = vcmp.lt.f32.partialorder %v1683_v10, 0 }
 0x114   : > { %v1429_v51 = vpop.eup %1428  ;;  %v1194_v47 = vmul.f32 0.7, %v1427_v49  ;;  %1448 = vlog2.f32 %v1218_v34  ;;  %v1839_v44 = vmul.f32 5.0, %v1706_v25  ;;  %v1140_v15 = vand.u32 2147483647, %v1736_v23 }
 0x115   : > { %v1431_v52 = vpop.eup %1430  ;;  %1450 = vrcp.f32 %v515_v33  ;;  %v506_v63 = vadd.f32 1.0, %v1429_v51  ;;  %v1847_v40 = vmul.f32 5.0, %v1699_v18 }
 0x116   : > { %v1433_v61 = vpop.eup %1432  ;;  %1452 = vpow2.f32 %v1194_v47  ;;  %v986_v1 = vmul.f32 0.7, %v1431_v52 }
 0x117   : > { %v1435_v54 = vpop.eup %1434  ;;  %v960_v62 = vmul.f32 0.7, %v1433_v61  ;;  %1454 = vlog2.f32 %v1010_v43 }
 0x118   : > { %v1437_v28 = vpop.eup %1436  ;;  %1456 = vpow2.f32 %v986_v1  ;;  %v1038_v8 = vmul.f32 0.7, %v1435_v54 }
 0x119   : > { %v1747_v9 = vpop.eup %1438  ;;  %1458 = vpow2.f32 %v960_v62  ;;  %v1168_v13 = vmul.f32 0.7, %v1437_v28 }
 0x11a   : > { %v1441_v14 = vpop.eup %1440  ;;  %1460 = vpow2.f32 %v1038_v8 }
 0x11b   : > { %v1443_v22 = vpop.eup %1442  ;;  %1462 = vpow2.f32 %v1168_v13  ;;  %v1246_v56 = vmul.f32 0.7, %v1441_v14 }
 0x11c   : > { %v1768_v26 = vpop.eup %1444  ;;  %1464 = vrcp.f32 %v506_v63  ;;  %v1851_v25 = vadd.f32 1.0, %v1443_v22 }
 0x11d   : > { %v1782_v32 = vpop.eup %1446  ;;  %1466 = vpow2.f32 %v1246_v56 }
 0x11e   : > { %v1449_v33 = vpop.eup %1448  ;;  %1468 = vlog2.f32 %v1088_v20 }
 0x11f   : > { %v1810_v11 = vpop.eup %1450  ;;  %v1220_v45 = vmul.f32 0.7, %v1449_v33  ;;  %1470 = vlog2.f32 %v1062_v60 }
 0x120   : > { %v1453_v49 = vpop.eup %1452  ;;  %1472 = vlog2.f32 %v1296_v30 }
 0x121   : > { %v1455_v6 = vpop.eup %1454  ;;  %v1202_v42 = vsel %vm1196_vm1, 2143289344, %v1453_v49  ;;  %1474 = vpow2.f32 %v1220_v45  ;;  %vm1249_vm1 = vcmp.eq.f32.partialorder %v1683_v10, 0 }
 0x122   : > { %v1457_v47 = vpop.eup %1456  ;;  %v1203_v52 = vsel %vm1197_vm2, 0, %v1202_v42  ;;  %v1012_v61 = vmul.f32 0.7, %v1455_v6  ;;  %1476 = vlog2.f32 %v1270_v36  ;;  %vm1172_vm2 = vcmp.eq.f32.partialorder %v1671_v2, 1065353216 }
 0x123   : > { %v1459_v1 = vpop.eup %1458  ;;  %v1208_v54 = vsel %vm1758_vm3, 2139095040, %v1203_v52  ;;  %v994_v62 = vsel %vm988_vm4, 2143289344, %v1457_v47  ;;  %1478 = vlog2.f32 %v1140_v15  ;;  %vm1870_vm3 = vcmp.eq.f32.partialorder %v1244_v19, 2139095040 }
 0x124   : > { %v1461_v18 = vpop.eup %1460  ;;  %v1212_v28 = vsel %vm1209_vm5, 2143289344, %v1208_v54  ;;  %v995_v63 = vsel %vm989_vm6, 0, %v994_v62  ;;  %v968_v8 = vsel %vm962_vm9, 2143289344, %v1459_v1  ;;  %1480 = vpow2.f32 %v1012_v61 }
 0x125   : > { %v1463_v14 = vpop.eup %1462  ;;  %v1213_v39 = vsel %vm1198_vm7, 1065353216, %v1212_v28  ;;  %v1000_v22 = vsel %vm1773_vm8, 2139095040, %v995_v63  ;;  %vm2278_vm4 = vcmp.eq.f32.partialorder %v1660_v55, 0  ;;  %vm2279_vm5 = vcmp.lt.f32.partialorder %v1664_v57, 0 }
 0x126   : > { %v969_v56 = vsel %vm2278_vm4, 0, %v968_v8  ;;  %v1046_v33 = vsel %vm2279_vm5, 2143289344, %v1461_v18  ;;  %v1885_v19 = vpop.eup %1464  ;;  %v879_v45 = vadd.f32 -2.0, %v1213_v39  ;;  %vm2280_vm7 = vcmp.ne.f32.partialorder %v1657_v53, %v1657_v53 }
 0x127   : > { %v1004_v59 = vsel %vm2280_vm7, 2143289344, %v1000_v22  ;;  %v974_v49 = vsel %vm1790_vm13, 2139095040, %v969_v56  ;;  %vm2281_vm8 = vcmp.eq.f32.partialorder %v1664_v57, 0  ;;  %vm1250_vm4 = vcmp.eq.f32.partialorder %v1683_v10, 1065353216  ;;  %v1467_v42 = vpop.eup %1466 }
 0x128   : > { %v1047_v6 = vsel %vm2281_vm8, 0, %v1046_v33  ;;  %vm1223_vm5 = vcmp.eq.f32.partialorder %v1695_v16, 0  ;;  %vm2282_vm9 = vcmp.eq.f32.partialorder %v1657_v53, 1065353216  ;;  %vm2283_vm6 = vcmp.ne.f32.partialorder %v1660_v55, %v1660_v55  ;;  %v1469_v53 = vpop.eup %1468 }
 0x129   : > { %v1005_v47 = vsel %vm2282_vm9, 1065353216, %v1004_v59  ;;  %v978_v52 = vsel %vm2283_vm6, 2143289344, %v974_v49  ;;  %v1052_v61 = vsel %vm1804_vm11, 2139095040, %v1047_v6  ;;  %v1176_v3 = vsel %vm1170_vm12, 2143289344, %v1463_v14 }
 0x12a   : > { %vm1912_vm13 = vcmp.eq.f32.partialorder %v1218_v34, 2139095040  ;;  %vm1014_vm7 = vcmp.lt.f32.partialorder %v1704_v21, 0  ;;  %vm2286_vm9 = vcmp.lt.s32.totalorder %v1724_v24, 5  ;;  %v871_v62 = vadd.f32 -2.0, %v1005_v47  ;;  %v1471_v34 = vpop.eup %1470 }
 0x12b   : > { %v638_v54 = vsel %vm2286_vm9, %v1754_v17, %v879_v45  ;;  %vm2287_vm6 = vcmp.eq.f32.partialorder %v1660_v55, 1065353216  ;;  %vm2288_vm11 = vcmp.ne.f32.partialorder %v1664_v57, %v1664_v57  ;;  %vm1235_vm12 = vcmp.ne.f32.partialorder %v1695_v16, %v1695_v16  ;;  %v1473_v14 = vpop.eup %1472 }
 0x12c   : > { %v979_v5 = vsel %vm2287_vm6, 1065353216, %v978_v52  ;;  %v1056_v18 = vsel %vm2288_vm11, 2143289344, %v1052_v61  ;;  %vm1015_vm8 = vcmp.eq.f32.partialorder %v1704_v21, 0  ;;  %v661_v28 = vmul.f32 %v1890_v46, %v638_v54  ;;  %vm2291_vm11 = vmmov %vm2286_vm9  ;;  %v1475_v33 = vpop.eup %1474 }
 0x12d   : > { %v870_v63 = vadd.f32 -2.0, %v979_v5  ;;  %v1057_v17 = vsel %vm1042_vm0, 1065353216, %v1056_v18  ;;  %v1177_v55 = vsel %vm1171_vm14, 0, %v1176_v3  ;;  %vm1936_vm6 = vcmp.eq.f32.partialorder %v1010_v43, 2139095040  ;;  %v1477_v51 = vpop.eup %1476 }
 0x12e   : > { %v630_v39 = vsel %vm2291_vm11, %v1751_v12, %v871_v62  ;;  %v873_v22 = vadd.f32 -2.0, %v1057_v17  ;;  %v1182_v57 = vsel %vm1833_vm15, 2139095040, %v1177_v55  ;;  %v1254_v56 = vsel %vm1248_vm10, 2143289344, %v1467_v42  ;;  %vm2294_vm10 = vmmov %vm2286_vm9  ;;  %v1479_v47 = vpop.eup %1478 }
 0x12f   : > { %vm1027_vm14 = vcmp.ne.f32.partialorder %v1704_v21, %v1704_v21  ;;  %vm2292_vm0 = vcmask 80896   ;;  %v653_v45 = vmul.f32 %v1890_v46, %v630_v39  ;;  %v629_v59 = vsel %vm2286_vm9, %v1778_v29, %v870_v63  ;;  %v1481_v62 = vpop.eup %1480 }
 0x130   : > { %v696_v43 = vsel %vm2292_vm0, %v661_v28, 0.0  ;;  %vm2293_vm11 = vcmp.ne.f32.partialorder %v1671_v2, %v1671_v2  ;;  %vm1016_vm15 = vcmp.eq.f32.partialorder %v1704_v21, 1065353216  ;;  %v652_v49 = vmul.f32 %v1890_v46, %v629_v59  ;;  %vm2295_vm9 = vmmov %vm2292_vm0 }
 0x131   : > { %v1186_v12 = vsel %vm2293_vm11, 2143289344, %v1182_v57  ;;  %697 = vadd.xlane.f32.xlu1 %v696_v43  ;;  %v632_v6 = vsel %vm2294_vm10, %v1795_v4, %v873_v22  ;;  %v1255_v29 = vsel %vm1249_vm1, 0, %v1254_v56  ;;  %v672_v52 = vsel %vm2295_vm9, %v653_v45, 0.0  ;;  %vm2298_vm1 = vmmov %vm2292_vm0 }
 0x132   : > { %v1187_v42 = vsel %vm1172_vm2, 1065353216, %v1186_v12  ;;  %v655_v61 = vmul.f32 %v1890_v46, %v632_v6  ;;  %v1260_v54 = vsel %vm1870_vm3, 2139095040, %v1255_v29  ;;  %673 = vadd.xlane.f32.xlu0 %v672_v52  ;;  %v669_v5 = vsel %vm2292_vm0, %v652_v49, 0.0  ;;  %vm2299_vm3 = vmmov %vm2294_vm10 }
 0x133   : > { %v878_v3 = vadd.f32 -2.0, %v1187_v42  ;;  %vm2296_vm11 = vcmp.ne.f32.partialorder %v1683_v10, %v1683_v10  ;;  %vm2297_vm2 = vcmp.lt.f32.partialorder %v1695_v16, 0  ;;  %v1090_v18 = vmul.f32 0.7, %v1469_v53 }
 0x134   : > { %v1264_v2 = vsel %vm2296_vm11, 2143289344, %v1260_v54  ;;  %v1228_v4 = vsel %vm2297_vm2, 2143289344, %v1475_v33  ;;  %v678_v28 = vsel %vm2298_vm1, %v655_v61, 0.0  ;;  %v1020_v53 = vsel %vm1014_vm7, 2143289344, %v1481_v62  ;;  %vm2307_vm2 = vmmov %vm2298_vm1 }
 0x135   : > { %v637_v63 = vsel %vm2294_vm10, %v1816_v38, %v878_v3  ;;  %v1265_v13 = vsel %vm1250_vm4, 1065353216, %v1264_v2  ;;  %v1229_v17 = vsel %vm1223_vm5, 0, %v1228_v4  ;;  %679 = vadd.xlane.f32.xlu1 %v678_v28  ;;  %v1021_v10 = vsel %vm1015_vm8, 0, %v1020_v53  ;;  %vm2303_vm8 = vmmov %vm2299_vm3 }
 0x136   : > { %v660_v55 = vmul.f32 %v1890_v46, %v637_v63  ;;  %v881_v39 = vadd.f32 -2.0, %v1265_v13  ;;  %v1234_v22 = vsel %vm1912_vm13, 2139095040, %v1229_v17  ;;  %1482 = vpow2.f32 %v1090_v18  ;;  %670 = vadd.xlane.f32.xlu0 %v669_v5  ;;  %vm2301_vm13 = vmmov %vm2292_vm0 }
 0x137   : > { %v1238_v38 = vsel %vm1235_vm12, 2143289344, %v1234_v22  ;;  %v1064_v57 = vmul.f32 0.7, %v1471_v34  ;;  %vm2300_vm4 = vcmp.eq.f32.partialorder %v1695_v16, 1065353216  ;;  %v1026_v33 = vsel %vm1936_vm6, 2139095040, %v1021_v10  ;;  %vm2302_vm12 = vmmov %vm2292_vm0 }
 0x138   : > { %v640_v56 = vsel %vm2299_vm3, %v1825_v41, %v881_v39  ;;  %v1239_v1 = vsel %vm2300_vm4, 1065353216, %v1238_v38  ;;  %v2002_v43 = vmul.f32 5.0, %v1712_v31  ;;  %v1030_v34 = vsel %vm1027_vm14, 2143289344, %v1026_v33  ;;  %vm2310_vm4 = vmmov %vm2307_vm2 }
 0x139   : > { %v663_v45 = vmul.f32 %v1890_v46, %v640_v56  ;;  %v880_v59 = vadd.f32 -2.0, %v1239_v1  ;;  %vm1092_vm5 = vcmp.lt.f32.partialorder %v1728_v48, 0  ;;  %1484 = vpow2.f32 %v1064_v57 }
 0x13a   : > { %v693_v41 = vsel %vm2301_vm13, %v660_v55, 0.0  ;;  %v1031_v16 = vsel %vm1016_vm15, 1065353216, %v1030_v34  ;;  %vm1093_vm7 = vcmp.eq.f32.partialorder %v1728_v48, 0  ;;  %v1298_v8 = vmul.f32 0.7, %v1473_v14  ;;  %vm2306_vm15 = vmmov %vm2299_vm3 }
 0x13b   : > { %v1272_v31 = vmul.f32 0.7, %v1477_v51  ;;  %v702_v12 = vsel %vm2302_vm12, %v663_v45, 0.0  ;;  %v639_v49 = vsel %vm2303_vm8, %v1839_v44, %v880_v59  ;;  %v872_v6 = vadd.f32 -2.0, %v1031_v16  ;;  %694 = vadd.xlane.f32.xlu0 %v693_v41 }
 0x13c   : > { %v1142_v42 = vmul.f32 0.7, %v1479_v47  ;;  %703 = vadd.xlane.f32.xlu1 %v702_v12  ;;  %v662_v29 = vmul.f32 %v1890_v46, %v639_v49  ;;  %vm2020_vm6 = vcmp.eq.f32.partialorder %v1088_v20, 2139095040  ;;  %vm1105_vm14 = vcmp.ne.f32.partialorder %v1728_v48, %v1728_v48 }
 0x13d   : > { %1486 = vpow2.f32 %v1298_v8  ;;  %v631_v44 = vsel %vm2306_vm15, %v1847_v40, %v872_v6  ;;  %vm1094_vm9 = vcmp.eq.f32.partialorder %v1728_v48, 1065353216  ;;  %v2031_v14 = vmul.f32 5.0, %v1747_v9 }
 0x13e   : > { %1488 = vpow2.f32 %v1272_v31  ;;  %v1114_v51 = vand.u32 2147483647, %v1740_v35  ;;  %v654_v20 = vmul.f32 %v1890_v46, %v631_v44  ;;  %vm1066_vm0 = vcmp.lt.f32.partialorder %v1732_v50, 0 }
 0x13f   : > { %vm1067_vm11 = vcmp.eq.f32.partialorder %v1732_v50, 0  ;;  %1490 = vpow2.f32 %v1142_v42  ;;  %v699_v47 = vsel %vm2307_vm2, %v662_v29, 0.0  ;;  %vm1068_vm1 = vcmp.eq.f32.partialorder %v1732_v50, 1065353216 }
 0x140   : > { %vm2041_vm10 = vcmp.eq.f32.partialorder %v1062_v60, 2139095040  ;;  %vm1079_vm3 = vcmp.ne.f32.partialorder %v1732_v50, %v1732_v50  ;;  %700 = vadd.xlane.f32.xlu0 %v699_v47  ;;  %v675_v9 = vsel %vm2310_vm4, %v654_v20, 0.0  ;;  %v2049_v52 = vmul.f32 5.0, %v1716_v37  ;;  %v1483_v3 = vpop.eup %1482 }
 0x141   : > { %1492 = vlog2.f32 %v1114_v51  ;;  %v1348_v61 = vand.u32 2147483647, %v1738_v27  ;;  %676 = vadd.xlane.f32.xlu1 %v675_v9  ;;  %vm1300_vm13 = vcmp.lt.f32.partialorder %v1730_v58, 0  ;;  %vm2058_vm8 = vcmp.eq.f32.partialorder %v1296_v30, 2139095040 }
 0x142   : > { %v1098_v37 = vsel %vm1092_vm5, 2143289344, %v1483_v3  ;;  %vm1302_vm2 = vcmp.eq.f32.partialorder %v1730_v58, 1065353216  ;;  %v560_v54 = vmul.f32 5.0, %v1768_v26  ;;  %vm1274_vm4 = vcmp.lt.f32.partialorder %v1734_v0, 0 }
 0x143   : > { %1494 = vlog2.f32 %v1348_v61  ;;  %v1485_v62 = vpop.eup %1484  ;;  %v1099_v30 = vsel %vm1093_vm7, 0, %v1098_v37  ;;  %vm1275_vm12 = vcmp.eq.f32.partialorder %v1734_v0, 0  ;;  %vm1276_vm15 = vcmp.eq.f32.partialorder %v1734_v0, 1065353216 }
 0x144   : > { %v1322_v5 = vand.u32 2147483647, %v1744_v7  ;;  %v1104_v2 = vsel %vm2020_vm6, 2139095040, %v1099_v30  ;;  %v1072_v26 = vsel %vm1066_vm0, 2143289344, %v1485_v62  ;;  %vm1287_vm5 = vcmp.ne.f32.partialorder %v1734_v0, %v1734_v0 }
 0x145   : > { %v555_v4 = vmul.f32 5.0, %v1782_v32  ;;  %v1108_v18 = vsel %vm1105_vm14, 2143289344, %v1104_v2  ;;  %v1073_v28 = vsel %vm1067_vm11, 0, %v1072_v26  ;;  %vm2090_vm7 = vcmp.eq.f32.partialorder %v1270_v36, 2139095040 }
 0x146   : > { %1496 = vlog2.f32 %v1322_v5  ;;  %v1109_v32 = vsel %vm1094_vm9, 1065353216, %v1108_v18  ;;  %v1078_v17 = vsel %vm2041_vm10, 2139095040, %v1073_v28  ;;  %vm1144_vm6 = vcmp.lt.f32.partialorder %v1736_v23, 0 }
 0x147   : > { %v1487_v13 = vpop.eup %1486  ;;  %vm1145_vm14 = vcmp.eq.f32.partialorder %v1736_v23, 0  ;;  %v875_v39 = vadd.f32 -2.0, %v1109_v32  ;;  %v1082_v36 = vsel %vm1079_vm3, 2143289344, %v1078_v17  ;;  %vm2109_vm0 = vcmp.eq.f32.partialorder %v1140_v15, 2139095040 }
 0x148   : > { %v1489_v55 = vpop.eup %1488  ;;  %v1306_v22 = vsel %vm1300_vm13, 2143289344, %v1487_v13  ;;  %v1083_v38 = vsel %vm1068_vm1, 1065353216, %v1082_v36  ;;  %vm2317_vm9 = vcmp.eq.f32.partialorder %v1730_v58, 0  ;;  %vm1157_vm11 = vcmp.ne.f32.partialorder %v1736_v23, %v1736_v23 }
 0x149   : > { %v1491_v53 = vpop.eup %1490  ;;  %v1307_v10 = vsel %vm2317_vm9, 0, %v1306_v22  ;;  %v1280_v57 = vsel %vm1274_vm4, 2143289344, %v1489_v55  ;;  %vm2318_vm10 = vcmp.lt.s32.totalorder %v1724_v24, 5  ;;  %v874_v56 = vadd.f32 -2.0, %v1083_v38 }
 0x14a   : > { %v634_v15 = vsel %vm2318_vm10, %v2002_v43, %v875_v39  ;;  %v1312_v1 = vsel %vm2058_vm8, 2139095040, %v1307_v10  ;;  %v1281_v50 = vsel %vm1275_vm12, 0, %v1280_v57  ;;  %vm2319_vm1 = vcmp.ne.f32.partialorder %v1730_v58, %v1730_v58  ;;  %vm2320_vm3 = vmmov %vm2318_vm10 }
 0x14b   : > { %v1493_v33 = vpop.eup %1492  ;;  %v657_v45 = vmul.f32 %v1890_v46, %v634_v15  ;;  %v1316_v59 = vsel %vm2319_vm1, 2143289344, %v1312_v1  ;;  %v1286_v34 = vsel %vm2090_vm7, 2139095040, %v1281_v50  ;;  %v1150_v43 = vsel %vm1144_vm6, 2143289344, %v1491_v53  ;;  %vm2323_vm8 = vmmov %vm2320_vm3 }
 0x14c   : > { %v633_v41 = vsel %vm2320_vm3, %v2031_v14, %v874_v56  ;;  %v1317_v16 = vsel %vm1302_vm2, 1065353216, %v1316_v59  ;;  %v1290_v8 = vsel %vm1287_vm5, 2143289344, %v1286_v34  ;;  %v1151_v31 = vsel %vm1145_vm14, 0, %v1150_v43  ;;  %vm2327_vm7 = vmmov %vm2320_vm3 }
 0x14d   : > { %v1495_v12 = vpop.eup %1494  ;;  %vm2321_vm13 = vcmask 80896   ;;  %v656_v6 = vmul.f32 %v1890_v46, %v633_v41  ;;  %v883_v42 = vadd.f32 -2.0, %v1317_v16  ;;  %v1291_v29 = vsel %vm1276_vm15, 1065353216, %v1290_v8  ;;  %vm2324_vm15 = vmmov %vm2320_vm3  ;;  %v887_v16 = vld [vmem:[#allocation2] ss:$0 sm:$0xff] }
 0x14e   : > { %v684_v49 = vsel %vm2321_vm13, %v657_v45, 0.0  ;;  %v882_v21 = vadd.f32 -2.0, %v1291_v29  ;;  %v1156_v58 = vsel %vm2109_vm0, 2139095040, %v1151_v31  ;;  %v1116_v44 = vmul.f32 0.7, %v1493_v33  ;;  %vm2322_vm12 = vmmov %vm2321_vm13 }
 0x14f   : > { %685 = vadd.xlane.f32.xlu1 %v684_v49  ;;  %v1350_v14 = vmul.f32 0.7, %v1495_v12  ;;  %v681_v20 = vsel %vm2322_vm12, %v656_v6, 0.0  ;;  %v642_v47 = vsel %vm2323_vm8, %v2049_v52, %v883_v42  ;;  %vm1146_vm2 = vcmp.eq.f32.partialorder %v1736_v23, 1065353216  ;;  %vm2325_vm4 = vmmov %vm2322_vm12 }
 0x150   : > { %v1160_v0 = vsel %vm1157_vm11, 2143289344, %v1156_v58  ;;  %v1497_v40 = vpop.eup %1496  ;;  %682 = vadd.xlane.f32.xlu0 %v681_v20  ;;  %v665_v9 = vmul.f32 %v1890_v46, %v642_v47  ;;  %v641_v3 = vsel %vm2324_vm15, %v560_v54, %v882_v21  ;;  %1498 = vpow2.f32 %v1116_v44  ;;  %vm2326_vm5 = vmmov %vm2325_vm4 }
 0x151   : > { %v1161_v60 = vsel %vm1146_vm2, 1065353216, %v1160_v0  ;;  %v664_v37 = vmul.f32 %v1890_v46, %v641_v3  ;;  %1500 = vpow2.f32 %v1350_v14  ;;  %v1324_v52 = vmul.f32 0.7, %v1497_v40  ;;  %vm2328_vm6 = vmmov %vm2325_vm4 }
 0x152   : > { %v877_v62 = vadd.f32 -2.0, %v1161_v60  ;;  %v708_v30 = vsel %vm2325_vm4, %v665_v9, 0.0  ;;  %v554_v18 = vmul.f32 5.0, %v1885_v19  ;;  %vm1118_vm14 = vcmp.lt.f32.partialorder %v1740_v35, 0 }
 0x153   : > { %709 = vadd.xlane.f32.xlu1 %v708_v30  ;;  %v705_v23 = vsel %vm2326_vm5, %v664_v37, 0.0  ;;  %1502 = vpow2.f32 %v1324_v52  ;;  %vm1119_vm0 = vcmp.eq.f32.partialorder %v1740_v35, 0  ;;  %vm1120_vm9 = vcmp.eq.f32.partialorder %v1740_v35, 1065353216 }
 0x154   : > { %v636_v2 = vsel %vm2327_vm7, %v555_v4, %v877_v62  ;;  %1504 = vrcp.f32 %v1851_v25  ;;  %706 = vadd.xlane.f32.xlu0 %v705_v23  ;;  %vm2177_vm11 = vcmp.eq.f32.partialorder %v1114_v51, 2139095040  ;;  %vm1131_vm10 = vcmp.ne.f32.partialorder %v1740_v35, %v1740_v35 }
 0x155   : > { %v659_v54 = vmul.f32 %v1890_v46, %v636_v2  ;;  %v563_v19 = vmul.f32 5.0, %v1810_v11  ;;  %vm1352_vm1 = vcmp.lt.f32.partialorder %v1738_v27, 0  ;;  %vm1353_vm3 = vcmp.eq.f32.partialorder %v1738_v27, 0 }
 0x156   : > { %vm1354_vm13 = vcmp.eq.f32.partialorder %v1738_v27, 1065353216  ;;  %vm1365_vm12 = vcmp.ne.f32.partialorder %v1738_v27, %v1738_v27  ;;  %vm1357_vm8 = vcmp.eq.f32.partialorder %v1348_v61, 2139095040  ;;  %vm1326_vm2 = vcmp.lt.f32.partialorder %v1744_v7, 0 }
 0x157   : > { %v690_v26 = vsel %vm2328_vm6, %v659_v54, 0.0  ;;  %vm1327_vm15 = vcmp.eq.f32.partialorder %v1744_v7, 0  ;;  %vm1331_vm4 = vcmp.eq.f32.partialorder %v1322_v5, 2139095040  ;;  %vm1339_vm5 = vcmp.ne.f32.partialorder %v1744_v7, %v1744_v7 }
 0x158   : > { %691 = vadd.xlane.f32.xlu1 %v690_v26  ;;  %vm1328_vm7 = vcmp.eq.f32.partialorder %v1744_v7, 1065353216  ;;  %vm2331_vm6 = vcmp.lt.s32.totalorder %v1724_v24, 5 }
 0x15a   : > { %v1499_v28 = vpop.eup %1498 }
 0x15b   : > { %v1501_v25 = vpop.eup %1500  ;;  %v1124_v63 = vsel %vm1118_vm14, 2143289344, %v1499_v28  ;;  %vm2332_vm14 = vmmov %vm2331_vm6 }
 0x15c   : > { %v1125_v13 = vsel %vm1119_vm0, 0, %v1124_v63  ;;  %v1358_v32 = vsel %vm1352_vm1, 2143289344, %v1501_v25  ;;  %vm2333_vm0 = vcmask 80896   ;;  %vm740_vm1 = vcmask 7168  }
 0x15d   : > { %v1503_v51 = vpop.eup %1502  ;;  %v1130_v17 = vsel %vm2177_vm11, 2139095040, %v1125_v13  ;;  %v1359_v55 = vsel %vm1353_vm3, 0, %v1358_v32  ;;  %vm2335_vm11 = vmmov %vm2333_vm0 }
 0x15e   : > { %v1505_v11 = vpop.eup %1504  ;;  %v1134_v39 = vsel %vm1131_vm10, 2143289344, %v1130_v17  ;;  %v1364_v36 = vsel %vm1357_vm8, 2139095040, %v1359_v55  ;;  %v1332_v22 = vsel %vm1326_vm2, 2143289344, %v1503_v51  ;;  %vm2336_vm10 = vmmov %vm2333_vm0 }
 0x15f   : > { %v1135_v48 = vsel %vm1120_vm9, 1065353216, %v1134_v39  ;;  %v1368_v53 = vsel %vm1365_vm12, 2143289344, %v1364_v36  ;;  %v1333_v61 = vsel %vm1327_vm15, 0, %v1332_v22  ;;  %v562_v56 = vmul.f32 5.0, %v1505_v11  ;;  %vm2334_vm9 = vmmov %vm2331_vm6 }
 0x160   : > { %v876_v38 = vadd.f32 -2.0, %v1135_v48  ;;  %v1369_v10 = vsel %vm1354_vm13, 1065353216, %v1368_v53  ;;  %v1338_v57 = vsel %vm1331_vm4, 2139095040, %v1333_v61 }
 0x161   : > { %v885_v15 = vadd.f32 -2.0, %v1369_v10  ;;  %v1342_v1 = vsel %vm1339_vm5, 2143289344, %v1338_v57 }
 0x162   : > { %v635_v35 = vsel %vm2331_vm6, %v554_v18, %v876_v38  ;;  %v1343_v50 = vsel %vm1328_vm7, 1065353216, %v1342_v1 }
 0x163   : > { %v658_v5 = vmul.f32 %v1890_v46, %v635_v35  ;;  %v644_v27 = vsel %vm2332_vm14, %v563_v19, %v885_v15  ;;  %v884_v33 = vadd.f32 -2.0, %v1343_v50 }
 0x164   : > { %v667_v45 = vmul.f32 %v1890_v46, %v644_v27 }
 0x165   : > { %v687_v59 = vsel %vm2333_vm0, %v658_v5, 0.0  ;;  %v643_v34 = vsel %vm2334_vm9, %v562_v56, %v884_v33 }
 0x166   : > { %688 = vadd.xlane.f32.xlu0 %v687_v59  ;;  %v714_v7 = vsel %vm2335_vm11, %v667_v45, 0.0  ;;  %v666_v43 = vmul.f32 %v1890_v46, %v643_v34 }
 0x167   : > { %715 = vadd.xlane.f32.xlu1 %v714_v7 }
 0x168   : > { %v711_v41 = vsel %vm2336_vm10, %v666_v43, 0.0 }
 0x16a   : > { %712 = vadd.xlane.f32.xlu0 %v711_v41 }
 0x1be   : > { %v698_v24 = vpop.xlane.xlu1 %697 }
 0x1bf   : > { %v733_v8 = vadd.f32 %v887_v16, %v698_v24  ;;  %v674_v46 = vpop.xlane.xlu0 %673 }
 0x1c0   : > { %v725_v31 = vadd.f32 %v887_v16, %v674_v46 }
 0x1c1   : > { %750 = vst.msk [vmem:[%s2224_s9 + $0x48] sm:$0xff] %vm740_vm1, %v733_v8 }
 0x1c2   : > { %v680_v12 = vpop.xlane.xlu1 %679  ;;  %742 = vst.msk [vmem:[%s2224_s9 + $0x8] sm:$0xff] %vm740_vm1, %v725_v31 }
 0x1c3   : > { %v727_v49 = vadd.f32 %v887_v16, %v680_v12  ;;  %v671_v6 = vpop.xlane.xlu0 %670 }
 0x1c4   : > { %v724_v42 = vadd.f32 %v887_v16, %v671_v6 }
 0x1c5   : > { %744 = vst.msk [vmem:[%s2224_s9 + $0x18] sm:$0xff] %vm740_vm1, %v727_v49 }
 0x1c6   : > { %741 = vst.msk [vmem:[%s2224_s9] sm:$0xff] %vm740_vm1, %v724_v42 }
 0x1c8   : > { %v695_v29 = vpop.xlane.xlu0 %694 }
 0x1c9   : > { %v704_v21 = vpop.xlane.xlu1 %703  ;;  %v732_v58 = vadd.f32 %v887_v16, %v695_v29 }
 0x1ca   : > { %v735_v44 = vadd.f32 %v887_v16, %v704_v21 }
 0x1cb   : > { %749 = vst.msk [vmem:[%s2224_s9 + $0x40] sm:$0xff] %vm740_vm1, %v732_v58 }
 0x1cc   : > { %752 = vst.msk [vmem:[%s2224_s9 + $0x58] sm:$0xff] %vm740_vm1, %v735_v44 }
 0x1cd   : > { %v701_v14 = vpop.xlane.xlu0 %700 }
 0x1ce   : > { %v734_v20 = vadd.f32 %v887_v16, %v701_v14  ;;  %v677_v47 = vpop.xlane.xlu1 %676 }
 0x1cf   : > { %v726_v0 = vadd.f32 %v887_v16, %v677_v47 }
 0x1d0   : > { %751 = vst.msk [vmem:[%s2224_s9 + $0x50] sm:$0xff] %vm740_vm1, %v734_v20 }
 0x1d1   : > { %743 = vst.msk [vmem:[%s2224_s9 + $0x10] sm:$0xff] %vm740_vm1, %v726_v0 }
 0x1dc   : > { %v686_v40 = vpop.xlane.xlu1 %685 }
 0x1dd   : > { %v729_v9 = vadd.f32 %v887_v16, %v686_v40  ;;  %v683_v3 = vpop.xlane.xlu0 %682 }
 0x1de   : > { %v728_v60 = vadd.f32 %v887_v16, %v683_v3 }
 0x1df   : > { %746 = vst.msk [vmem:[%s2224_s9 + $0x28] sm:$0xff] %vm740_vm1, %v729_v9 }
 0x1e0   : > { %745 = vst.msk [vmem:[%s2224_s9 + $0x20] sm:$0xff] %vm740_vm1, %v728_v60  ;;  %v710_v37 = vpop.xlane.xlu1 %709 }
 0x1e1   : > { %v737_v62 = vadd.f32 %v887_v16, %v710_v37  ;;  %v707_v52 = vpop.xlane.xlu0 %706 }
 0x1e2   : > { %v736_v30 = vadd.f32 %v887_v16, %v707_v52 }
 0x1e3   : > { %754 = vst.msk [vmem:[%s2224_s9 + $0x68] sm:$0xff] %vm740_vm1, %v737_v62 }
 0x1e4   : > { %753 = vst.msk [vmem:[%s2224_s9 + $0x60] sm:$0xff] %vm740_vm1, %v736_v30 }
 0x1e5   : > { %v692_v23 = vpop.xlane.xlu1 %691 }
 0x1e6   : > { %v731_v2 = vadd.f32 %v887_v16, %v692_v23 }
 0x1e8   : > { %748 = vst.msk [vmem:[%s2224_s9 + $0x38] sm:$0xff] %vm740_vm1, %v731_v2 }
 0x1f3   : > { %v689_v54 = vpop.xlane.xlu0 %688 }
 0x1f4   : > { %v730_v26 = vadd.f32 %v887_v16, %v689_v54  ;;  %v716_v18 = vpop.xlane.xlu1 %715 }
 0x1f5   : > { %v739_v28 = vadd.f32 %v887_v16, %v716_v18 }
 0x1f6   : > { %747 = vst.msk [vmem:[%s2224_s9 + $0x30] sm:$0xff] %vm740_vm1, %v730_v26 }
 0x1f7   : > { %756 = vst.msk [vmem:[%s2224_s9 + $0x78] sm:$0xff] %vm740_vm1, %v739_v28  ;;  %v713_v4 = vpop.xlane.xlu0 %712 }
 0x1f8   : > { %v738_v25 = vadd.f32 %v887_v16, %v713_v4 }
 0x1fa   : > { %755 = vst.msk [vmem:[%s2224_s9 + $0x70] sm:$0xff] %vm740_vm1, %v738_v25 }
 0x1fb PF: > { %s16_s17 = sadd.s32 1, %s1512_s17  }
 0x1fc   : > { %p13_p4 = scmp.ge.s32.totalorder %s16_s17, 4  }
 0x1fe   :  { %15 = sbr.rel (!%p13_p4) target bundleno = 3 (0x3), region = 66 }

</bundles_post_ra>
